<compile_context>
chip_gen: v7x
topology: tpu7x:2x2x1
jax: 0.10.0
libtpu: 0.0.40
codegen_flags: <defaults>
</compile_context>

<pallas_src>
import functools

import jax
import jax.numpy as jnp
from jax import lax
from jax.experimental import pallas as pl
from jax.experimental.pallas import tpu as pltpu


def wave_block_kernel(x_ref, halo_ref, wg_ref, bg_ref, w4_ref, b4_ref, o_ref,
                      *, kernel_size, dilation, pad, halo_w, compute_dtype):
    """One (C, block_l) tile: fused gated dilated conv + 1x1 conv + residual."""
    C, tL = o_ref.shape
    K = kernel_size

    xc = x_ref[...]                                       # (C, tL)
    if pad > 0:
        h = halo_ref[...]                                 # (C, 2*pad) = [left|right]
        xp = jnp.concatenate([h[:, :pad], xc, h[:, halo_w - pad:]], axis=1)
    else:
        xp = xc                                           # (C, tL + 2*pad)

    xp_c = xp.astype(compute_dtype)                       # MXU operand cast only

    # im2col slab: stack the K dilated taps along sublanes -> (K*C, tL).
    slab = jnp.concatenate(
        [xp_c[:, k * dilation: k * dilation + tL] for k in range(K)], axis=0)

    # Single fused matmul for conv2 and conv3: (2C, K*C) @ (K*C, tL).
    g = jnp.dot(wg_ref[...], slab, preferred_element_type=jnp.float32)
    g = g + bg_ref[...]                                   # (2C, tL), f32

    # Gating (kept f32 — v5e has no bf16 VPU/EUP).
    gated = jnp.tanh(g[:C]) * jax.nn.sigmoid(g[C:])

    # conv4 (1x1) + bias + residual.
    y = jnp.dot(w4_ref[...], gated.astype(compute_dtype),
                preferred_element_type=jnp.float32) + b4_ref[...]
    o_ref[...] = (y + xc.astype(jnp.float32)).astype(o_ref.dtype)


def _pick_block_l(L, target=2048):
    """Largest multiple-of-128 divisor of L up to `target` (lane-dense tiles)."""
    if L % 128 != 0:
        return L                       # single full-length block (still legal)
    best = 128
    t = 256
    while t <= min(L, target):
        if L % t == 0:
            best = t
        t += 128
    return best


def wave_block_pallas(x, w2, b2, w3, b3, w4, b4, *, kernel_size, dilation,
                      block_l=None, compute_dtype=jnp.float32):
    """x: (N, C, L); weights in PyTorch Conv1d layout (Cout, Cin, K)."""
    N, C, L = x.shape
    K = kernel_size
    rf = dilation * (K - 1)
    # 'same' length (and thus the residual add) only works for an odd receptive
    # field — same constraint as the PyTorch module.
    assert rf % 2 == 0, "dilation*(kernel_size-1) must be even for 'same' output"
    pad = (K + (K - 1) * (dilation - 1)) // 2

    if block_l is None:
        block_l = _pick_block_l(L)
    assert L % block_l == 0, "block_l must divide L"
    nb = L // block_l

    # --- tiny halo tensor: per block, [last pad cols of prev | first pad cols
    # of next], zeros at the sequence edges (== the conv zero padding). ------
    hw = max(2 * pad, 2)
    if pad > 0:
        xr = x.reshape(N, C, nb, block_l)
        zero = jnp.zeros((N, C, 1, pad), x.dtype)
        left = jnp.concatenate([zero, xr[:, :, :nb - 1, block_l - pad:]], axis=2)
        right = jnp.concatenate([xr[:, :, 1:, :pad], zero], axis=2)
        halo = jnp.transpose(jnp.concatenate([left, right], axis=3),
                             (0, 2, 1, 3))                # (N, nb, C, 2*pad)
    else:
        halo = jnp.zeros((N, nb, C, hw), x.dtype)

    # --- pack weights: one (2C, K*C) matrix for conv2+conv3, (2C,1) bias. ----
    wg = jnp.concatenate(
        [jnp.transpose(w2, (0, 2, 1)).reshape(C, K * C),
         jnp.transpose(w3, (0, 2, 1)).reshape(C, K * C)], axis=0
    ).astype(compute_dtype)                               # wg[o, k*C + c] = w[o, c, k]
    bg = jnp.concatenate([b2, b3])[:, None].astype(jnp.float32)   # (2C, 1)
    w4s = w4[:, :, 0].astype(compute_dtype)               # (C, C)
    b4c = b4[:, None].astype(jnp.float32)                 # (C, 1)

    kernel = functools.partial(
        wave_block_kernel, kernel_size=K, dilation=dilation, pad=pad,
        halo_w=hw, compute_dtype=compute_dtype)

    # VMEM budget: tiles + intermediates (upper bound, f32), 2x headroom,
    # clamped to fit v7x's 64 MiB physical VMEM.
    itemsize = 4
    live = (K + 10) * C * block_l * itemsize
    params = (wg.size + bg.size + w4s.size + b4c.size) * itemsize
    vmem_limit = int(min(64 << 20, max(32 << 20, 2 * (live + params))))

    return pl.pallas_call(
        kernel,
        out_shape=jax.ShapeDtypeStruct((N, C, L), x.dtype),
        grid=(N, nb),
        in_specs=[
            pl.BlockSpec((None, C, block_l), lambda n, j: (n, 0, j)),     # x tile
            pl.BlockSpec((None, None, C, hw), lambda n, j: (n, j, 0, 0)),  # halo
            pl.BlockSpec((2 * C, K * C), lambda n, j: (0, 0)),            # packed W
            pl.BlockSpec((2 * C, 1), lambda n, j: (0, 0)),                # packed b
            pl.BlockSpec((C, C), lambda n, j: (0, 0)),                    # w4 (1x1)
            pl.BlockSpec((C, 1), lambda n, j: (0, 0)),                    # b4
        ],
        out_specs=pl.BlockSpec((None, C, block_l), lambda n, j: (n, 0, j)),
        compiler_params=pltpu.CompilerParams(
            dimension_semantics=("parallel", "parallel"),
            vmem_limit_bytes=vmem_limit),
    )(x, halo, wg, bg, w4s, b4c)


# ---------------- pure-JAX reference (for verification only) ----------------

def _conv1d_ref(x, w, b, pad, dilation):
    y = lax.conv_general_dilated(
        x, w, window_strides=(1,), padding=((pad, pad),),
        rhs_dilation=(dilation,), dimension_numbers=("NCH", "OIH", "NCH"))
    return y + b[None, :, None]


def wave_block_ref(x, w2, b2, w3, b3, w4, b4, *, kernel_size, dilation):
    pad = (kernel_size + (kernel_size - 1) * (dilation - 1)) // 2
    t = jnp.tanh(_conv1d_ref(x, w2, b2, pad, dilation))
    s = jax.nn.sigmoid(_conv1d_ref(x, w3, b3, pad, dilation))
    res = t * s
    y = _conv1d_ref(res, w4, b4, 0, 1)
    return x + y


if __name__ == "__main__":
    # Small shapes consistent with the module's forward (conv2/conv3 consume
    # out_ch channels). L and block_l chosen so the multi-block halo path is
    # exercised (nb = 4).
    N, C, L = 2, 16, 512
    kernel_size, dilation = 3, 2

    key = jax.random.PRNGKey(0)
    kx, k2, kb2, k3, kb3, k4, kb4 = jax.random.split(key, 7)

    x = jax.random.normal(kx, (N, C, L), dtype=jnp.float32)
    w2 = jax.random.normal(k2, (C, C, kernel_size), dtype=jnp.float32) * 0.1
    b2 = jax.random.normal(kb2, (C,), dtype=jnp.float32) * 0.1
    w3 = jax.random.normal(k3, (C, C, kernel_size), dtype=jnp.float32) * 0.1
    b3 = jax.random.normal(kb3, (C,), dtype=jnp.float32) * 0.1
    w4 = jax.random.normal(k4, (C, C, 1), dtype=jnp.float32) * 0.1
    b4 = jax.random.normal(kb4, (C,), dtype=jnp.float32) * 0.1

    out = wave_block_pallas(x, w2, b2, w3, b3, w4, b4,
                            kernel_size=kernel_size, dilation=dilation,
                            block_l=128)                  # force 4 L-blocks
    out = jax.block_until_ready(out)

    ref = wave_block_ref(x, w2, b2, w3, b3, w4, b4,
                         kernel_size=kernel_size, dilation=dilation)
    ref = jax.block_until_ready(ref)

    assert out.shape == (N, C, L) and out.dtype == jnp.float32
    assert jnp.allclose(out, ref, atol=1e-4, rtol=1e-4), (
        float(jnp.max(jnp.abs(out - ref))))

    print("KERNEL_OK")
</pallas_src>

<mosaic_0001>
module attributes {stable_mosaic.version = 11 : i64} {
  func.func @wave_block_kernel(%arg0: i32, %arg1: i32, %arg2: memref<1x16x128xf32, #tpu.memory_space<vmem>>, %arg3: memref<1x1x16x4xf32, #tpu.memory_space<vmem>>, %arg4: memref<32x48xf32, #tpu.memory_space<vmem>>, %arg5: memref<32x1xf32, #tpu.memory_space<vmem>>, %arg6: memref<16x16xf32, #tpu.memory_space<vmem>>, %arg7: memref<16x1xf32, #tpu.memory_space<vmem>>, %arg8: memref<1x16x128xf32, #tpu.memory_space<vmem>>) attributes {dimension_semantics = [#tpu.dimension_semantics<parallel>, #tpu.dimension_semantics<parallel>], iteration_bounds = array<i64: 2, 4>, scalar_prefetch = 0 : i64, scratch_operands = 0 : i64, tpu.core_type = #tpu.core_type<tc>, window_params = [{transform_indices = @transform_0, window_bounds = array<i64: 1, 16, 128>}, {transform_indices = @transform_1, window_bounds = array<i64: 1, 1, 16, 4>}, {pipeline_mode = #tpu.pipeline_mode<synchronous>, transform_indices = @transform_2, window_bounds = array<i64: 32, 48>}, {pipeline_mode = #tpu.pipeline_mode<synchronous>, transform_indices = @transform_3, window_bounds = array<i64: 32, 1>}, {pipeline_mode = #tpu.pipeline_mode<synchronous>, transform_indices = @transform_4, window_bounds = array<i64: 16, 16>}, {pipeline_mode = #tpu.pipeline_mode<synchronous>, transform_indices = @transform_5, window_bounds = array<i64: 16, 1>}, {transform_indices = @transform_6, window_bounds = array<i64: 1, 16, 128>}]} {
    %c0 = arith.constant 0 : index
    %c0_0 = arith.constant 0 : index
    %c0_1 = arith.constant 0 : index
    %0 = vector.load %arg2[%c0, %c0_0, %c0_1] : memref<1x16x128xf32, #tpu.memory_space<vmem>>, vector<1x16x128xf32>
    %1 = vector.shape_cast %0 : vector<1x16x128xf32> to vector<16x128xf32>
    %c0_2 = arith.constant 0 : index
    %c0_3 = arith.constant 0 : index
    %c0_4 = arith.constant 0 : index
    %c0_5 = arith.constant 0 : index
    %2 = vector.load %arg3[%c0_2, %c0_3, %c0_4, %c0_5] : memref<1x1x16x4xf32, #tpu.memory_space<vmem>>, vector<1x1x16x4xf32>
    %3 = vector.shape_cast %2 : vector<1x1x16x4xf32> to vector<16x4xf32>
    %4 = vector.extract_strided_slice %3 {offsets = [0, 0], sizes = [16, 2], strides = [1, 1]} : vector<16x4xf32> to vector<16x2xf32>
    %5 = vector.extract_strided_slice %3 {offsets = [0, 2], sizes = [16, 2], strides = [1, 1]} : vector<16x4xf32> to vector<16x2xf32>
    %6 = tpu.concatenate %4, %1, %5 in 1 : vector<16x2xf32>, vector<16x128xf32>, vector<16x2xf32> -> vector<16x132xf32>
    %7 = vector.extract_strided_slice %6 {offsets = [0, 0], sizes = [16, 128], strides = [1, 1]} : vector<16x132xf32> to vector<16x128xf32>
    %8 = vector.extract_strided_slice %6 {offsets = [0, 2], sizes = [16, 128], strides = [1, 1]} : vector<16x132xf32> to vector<16x128xf32>
    %9 = vector.extract_strided_slice %6 {offsets = [0, 4], sizes = [16, 128], strides = [1, 1]} : vector<16x132xf32> to vector<16x128xf32>
    %10 = tpu.concatenate %7, %8, %9 in 0 : vector<16x128xf32>, vector<16x128xf32>, vector<16x128xf32> -> vector<48x128xf32>
    %c0_6 = arith.constant 0 : index
    %c0_7 = arith.constant 0 : index
    %11 = vector.load %arg4[%c0_6, %c0_7] : memref<32x48xf32, #tpu.memory_space<vmem>>, vector<32x48xf32>
    %cst = arith.constant dense<0.000000e+00> : vector<32x128xf32>
    %12 = tpu.matmul %11, %10, %cst {dimension_numbers = #tpu.dot_dimension_numbers<[1], [0], [0], [1], [0, 0, 1, 1], [], []>} : vector<32x48xf32>, vector<48x128xf32>, vector<32x128xf32> -> vector<32x128xf32>
    %c0_8 = arith.constant 0 : index
    %c0_9 = arith.constant 0 : index
    %13 = vector.load %arg5[%c0_8, %c0_9] : memref<32x1xf32, #tpu.memory_space<vmem>>, vector<32x1xf32>
    %14 = vector.broadcast %13 : vector<32x1xf32> to vector<32x128xf32>
    %15 = arith.addf %12, %14 : vector<32x128xf32>
    %16 = vector.extract_strided_slice %15 {offsets = [0, 0], sizes = [16, 128], strides = [1, 1]} : vector<32x128xf32> to vector<16x128xf32>
    %17 = math.tanh %16 : vector<16x128xf32>
    %18 = vector.extract_strided_slice %15 {offsets = [16, 0], sizes = [16, 128], strides = [1, 1]} : vector<32x128xf32> to vector<16x128xf32>
    %19 = arith.negf %18 : vector<16x128xf32>
    %20 = math.exp %19 : vector<16x128xf32>
    %cst_10 = arith.constant 1.000000e+00 : f32
    %21 = vector.broadcast %cst_10 : f32 to vector<16x128xf32>
    %22 = arith.addf %21, %20 : vector<16x128xf32>
    %23 = arith.divf %21, %22 : vector<16x128xf32>
    %24 = arith.mulf %17, %23 : vector<16x128xf32>
    %c0_11 = arith.constant 0 : index
    %c0_12 = arith.constant 0 : index
    %25 = vector.load %arg6[%c0_11, %c0_12] : memref<16x16xf32, #tpu.memory_space<vmem>>, vector<16x16xf32>
    %cst_13 = arith.constant dense<0.000000e+00> : vector<16x128xf32>
    %26 = tpu.matmul %25, %24, %cst_13 {dimension_numbers = #tpu.dot_dimension_numbers<[1], [0], [0], [1], [0, 0, 1, 1], [], []>} : vector<16x16xf32>, vector<16x128xf32>, vector<16x128xf32> -> vector<16x128xf32>
    %c0_14 = arith.constant 0 : index
    %c0_15 = arith.constant 0 : index
    %27 = vector.load %arg7[%c0_14, %c0_15] : memref<16x1xf32, #tpu.memory_space<vmem>>, vector<16x1xf32>
    %28 = vector.broadcast %27 : vector<16x1xf32> to vector<16x128xf32>
    %29 = arith.addf %26, %28 : vector<16x128xf32>
    %30 = arith.addf %29, %1 : vector<16x128xf32>
    %c0_16 = arith.constant 0 : index
    %c0_17 = arith.constant 0 : index
    %c0_18 = arith.constant 0 : index
    %31 = vector.load %arg8[%c0_16, %c0_17, %c0_18] : memref<1x16x128xf32, #tpu.memory_space<vmem>>, vector<1x16x128xf32>
    %32 = vector.shape_cast %31 : vector<1x16x128xf32> to vector<16x128xf32>
    %33 = vector.shape_cast %30 : vector<16x128xf32> to vector<1x16x128xf32>
    tpu.vector_store %arg8[%c0_16, %c0_17, %c0_18], %33 {strides = array<i32>} : memref<1x16x128xf32, #tpu.memory_space<vmem>>, vector<1x16x128xf32>,
    return
  }
  func.func @transform_0(%arg0: i32, %arg1: i32) -> (i32, i32, i32) {
    %c0_i32 = arith.constant 0 : i32
    %c0_i32_0 = arith.constant 0 : i32
    return %arg0, %c0_i32, %arg1 : i32, i32, i32
  }
  func.func @transform_1(%arg0: i32, %arg1: i32) -> (i32, i32, i32, i32) {
    %c0_i32 = arith.constant 0 : i32
    %c0_i32_0 = arith.constant 0 : i32
    %c0_i32_1 = arith.constant 0 : i32
    return %arg0, %arg1, %c0_i32, %c0_i32_0 : i32, i32, i32, i32
  }
  func.func @transform_2(%arg0: i32, %arg1: i32) -> (i32, i32) {
    %c0_i32 = arith.constant 0 : i32
    %c0_i32_0 = arith.constant 0 : i32
    %c0_i32_1 = arith.constant 0 : i32
    return %c0_i32, %c0_i32_0 : i32, i32
  }
  func.func @transform_3(%arg0: i32, %arg1: i32) -> (i32, i32) {
    %c0_i32 = arith.constant 0 : i32
    %c0_i32_0 = arith.constant 0 : i32
    %c0_i32_1 = arith.constant 0 : i32
    return %c0_i32, %c0_i32_0 : i32, i32
  }
  func.func @transform_4(%arg0: i32, %arg1: i32) -> (i32, i32) {
    %c0_i32 = arith.constant 0 : i32
    %c0_i32_0 = arith.constant 0 : i32
    %c0_i32_1 = arith.constant 0 : i32
    return %c0_i32, %c0_i32_0 : i32, i32
  }
  func.func @transform_5(%arg0: i32, %arg1: i32) -> (i32, i32) {
    %c0_i32 = arith.constant 0 : i32
    %c0_i32_0 = arith.constant 0 : i32
    %c0_i32_1 = arith.constant 0 : i32
    return %c0_i32, %c0_i32_0 : i32, i32
  }
  func.func @transform_6(%arg0: i32, %arg1: i32) -> (i32, i32, i32) {
    %c0_i32 = arith.constant 0 : i32
    %c0_i32_0 = arith.constant 0 : i32
    return %arg0, %c0_i32, %arg1 : i32, i32, i32
  }
}

</mosaic_0001>

<bundles_post_ra>
// kernel: tpu_custom_call.1
= control target key start
LH: loop header
LB: loop body
LE: loop exit
PB: predicated region body
PF: predicated region fallthrough
CT: control target
= control target key end

     0   :  { %s1297_s0 = inlined_call_operand.vmem [shape: f32[2,16,512], index: 0, kind: input, shape index: {}]   ;;  %s1298_s1 = inlined_call_operand.vmem [shape: f32[2,4,16,4], index: 1, kind: input, shape index: {}]   ;;  %s1299_s2 = inlined_call_operand.vmem [shape: f32[32,48], index: 2, kind: input, shape index: {}]   ;;  %s1300_s3 = inlined_call_operand.vmem [shape: f32[32,1], index: 3, kind: input, shape index: {}]   ;;  %s1301_s4 = inlined_call_operand.vmem [shape: f32[16,16], index: 4, kind: input, shape index: {}]   ;;  %s1302_s5 = inlined_call_operand.vmem [shape: f32[16,1], index: 5, kind: input, shape index: {}]   ;;  %s1303_s6 = inlined_call_operand.hbm [shape: f32[2,16,512], index: 6, kind: output, shape index: {}]  }
   0x1   :  { %1305 = sst [smem:[#allocation6_spill]] %s1297_s0 }
   0x2   :  { %11 = vsyncpa [#allocation4], 0 }
   0x3   :  { %13 = vsyncpa [#allocation4 + $0x1], 0  ;;  %s1085_s21 = smov 0   ;;  %s1087_s22 = smov 0  }
   0x4   :  { %s1089_s23 = smov 0   ;;  %s1091_s24 = smov 0  }
   0x5   :  { %s1093_s25 = smov 0   ;;  %s1095_s26 = smov 0  }
   0x6   :  { %s1097_s27 = smov 0   ;;  %s1099_s28 = smov 0  }
   0x7 LB: > { %s748_s29 = sadd.s32 4294967295, %s1040_s28   ;;  %s749_s30 = sadd.s32 4294967294, %s1040_s28   ;;  %s1040_s28 = sphi %s1099_s28, %s19_s28   ;;  %s1036_s27 = sphi %s1097_s27, %s1317_s27   ;;  %s1032_s26 = sphi %s1095_s26, %s1316_s26   ;;  %s1028_s25 = sphi %s1093_s25, %s1315_s25   ;;  %s1024_s24 = sphi %s1091_s24, %s1314_s24   ;;  %s1020_s23 = sphi %s1089_s23, %s1313_s23   ;;  %s1016_s22 = sphi %s1087_s22, %s1312_s22   ;;  %s1012_s21 = sphi %s1085_s21, %s1311_s21  }
   0x8   : > { %s28_s7 = sadd.s32 1, %s1032_s26  ;;  %s31_s8 = sadd.s32 1, %s1036_s27 }
   0x9   : > { %p29_p0 = scmp.ge.s32.totalorder %s28_s7, 4  ;;  %p47_p1 = scmp.ne.s32.totalorder %s1020_s23, %s1016_s22 }
   0xa   : > { %p48_p2 = scmp.eq.s32.totalorder %s1040_s28, 0  ;;  %p191_p5 = scmp.eq.s32.totalorder %s748_s29, 7 }
   0xb   : > { %s1319_s7 = smov (%p29_p0, %s28_s7), 0  ;;  %s1321_s8 = smov (!%p29_p0, %s31_s8), %s1036_s27 }
   0xc   : > { %s36_s9 = ssub.s32 %s1032_s26, %s1319_s7  ;;  %p1137_p3 = por %p48_p2, %p47_p1 }
   0xd   : > { %p33_p4 = scmp.ge.s32.totalorder %s1321_s8, 2  ;;  %p196_p6 = scmp.ne.s32.totalorder %s1016_s22, %s1012_s21 }
   0xe   : > { %p197_p7 = scmp.eq.s32.totalorder %s749_s30, 7  ;;  %p1145_p8 = por %p191_p5, %p47_p1 }
   0xf   : > { %s1323_s8 = smov (%p33_p4, %s1321_s8), 0  ;;  %s40_s15 = sadd.s32 1, %s1020_s23 }
  0x10   : > { %p1149_p9 = por %p197_p7, %p196_p6  ;;  %s35_s13 = ssub.s32 %s1036_s27, %s1323_s8 }
  0x11   : > { %s37_s14 = sor.u32 %s36_s9, %s35_s13  ;;  %p751_p11 = scmp.ge.s32.totalorder %s1040_s28, 8 }
  0x12   : > { %p38_p10 = scmp.eq.s32.totalorder %s37_s14, 0 }
  0x13   : > { %225 = sbr.rel (%p751_p11) target bundleno = 38 (0x26), region = 32 }
  0x14   : > { %s1157_s16 = scalar_select %p38_p10, %s1020_s23, %s40_s15  }
  0x1a   : > { %228 = sbr.rel (!%p1137_p3) target bundleno = 38 (0x26), region = 36  ;;  %s230_s17 = sand.u32 (%p1137_p3), 1, %s1020_s23  }
  0x1b   : > { %s753_s18 = sshll.u32 (%p1137_p3), %s1036_s27, 3  ;;  %s752_s19 = sshll.u32 (%p1137_p3), %s230_s17, 4 }
  0x1c   : > { %s234_s20 = sadd.s32 (%p1137_p3), %s1032_s26, %s753_s18  ;;  %s1309_s0 = sld [smem:[#allocation6_spill]] (%p1137_p3) }
  0x1d   : > { %s754_s29 = sshll.u32 (%p1137_p3), %s234_s20, 3  ;;  %s232_s14 = scalar_lea.vmem (%p1137_p3), [#allocation2], %s752_s19 }
  0x22   : > { %s236_s13 = scalar_lea.vmem %s1309_s0, %s754_s29 }
  0x23   : > { %v266_v0 = vld [vmem:[%s236_s13] sm:$0xff] }
  0x24   : > { %v268_v1 = vld [vmem:[%s236_s13 + $0x20] sm:$0xff]  ;;  %267 = vst [vmem:[%s232_s14] sm:$0xff] %v266_v0 }
  0x25   : > { %269 = vst [vmem:[%s232_s14 + $0x8] sm:$0xff] %v268_v1 }
  0x26 PF: > { %p755_p12 = scmp.ge.s32.totalorder %s1040_s28, 1  ;;  %p286_p13 = scmp.lt.s32.totalorder %s1040_s28, 9 }
  0x28   : > { %p287_p0 = pnand %p755_p12, %p286_p13 }
  0x29   : > { %s1304_s10 = sand.u32 (!%p287_p0), 1, %s1016_s22   ;;  %s1042_s18 = smov (!%p287_p0), 2   ;;  %vm352_vm0 = vcmask (!%p287_p0), 15360   ;;  %v387_v17 = vld [vmem:[%s1299_s2] sm:$0xff] (!%p287_p0)  ;;  %vm415_vm1 = vcmask (!%p287_p0), 392192   ;;  %v1045_v18 = vmov (!%p287_p0), 0  }
  0x2a   : > { %290 = sbr.rel (%p287_p0) target bundleno = 781 (0x30d), region = 78  ;;  %s1173_s15 = sshll.u32 (!%p287_p0), %s1304_s10, 4  ;;  %800 = vmatprep.mubr.msk.f32.mxu0 (!%p287_p0), %vm415_vm1, %v387_v17  ;;  %932 = vset.pattern.permute.xlu1 (!%p287_p0), %v1045_v18  ;;  %v393_v19 = vld [vmem:[%s1300_s3 + $0x10] sm:$0xff] (!%p287_p0)  ;;  %v394_v20 = vld [vmem:[%s1300_s3 + $0x18] sm:$0xff] (!%p287_p0)  ;;  %v391_v21 = vld [vmem:[%s1300_s3] sm:$0xff] (!%p287_p0)  ;;  %vm369_vm2 = vcmask (!%p287_p0), 1031168  }
  0x2b   : > { %s295_s17 = scalar_lea.vmem (!%p287_p0), [#allocation2], %s1173_s15  ;;  %p331_p1 = scmp.lt.s32.totalorder (!%p287_p0), %s1028_s25, 1  ;;  %933 = vset.pattern.permute.xlu0 (!%p287_p0), %v1045_v18  ;;  %v531_v22 = vld [vmem:[%s1302_s5] sm:$0xff] (!%p287_p0)  ;;  %v392_v23 = vld [vmem:[%s1300_s3 + $0x8] sm:$0xff] (!%p287_p0)  ;;  %vm382_vm3 = vcmask (!%p287_p0), 1014784   ;;  %v389_v44 = vld [vmem:[%s1299_s2 + $0x10] sm:$0xff] (!%p287_p0) }
  0x2c   : > { %v1176_v2 = vld [vmem:[%s295_s17] sm:$0xff] (!%p287_p0)  ;;  %v1178_v3 = vld [vmem:[%s295_s17 + $0x8] sm:$0xff] (!%p287_p0)  ;;  %p333_p2 = scmp.lt.s32.totalorder (!%p287_p0), %s1024_s24, 3  ;;  %s1043_s10 = smov (!%p287_p0), 126   ;;  %vm543_vm4 = vcmask (!%p287_p0), 130048  }
  0x2d   : > { %v907_v4 = vpack.i.bf16 (!%p287_p0), %v1178_v3, %v1176_v2  ;;  %v532_v24 = vld [vmem:[%s1302_s5 + $0x8] sm:$0xff] (!%p287_p0)  ;;  %v390_v45 = vld [vmem:[%s1299_s2 + $0x18] sm:$0xff] (!%p287_p0)  ;;  %v529_v46 = vld [vmem:[%s1301_s4] sm:$0xff] (!%p287_p0) }
  0x2e   : > { %v388_v43 = vld [vmem:[%s1299_s2 + $0x8] sm:$0xff] (!%p287_p0)  ;;  %810 = vmatprep.mubr.msk.f32.mxu1 (!%p287_p0), %vm543_vm4, %v529_v46 }
  0x2f   : > { %908 = vrot.lane.b32.xlu0 (!%p287_p0), %v907_v4, %s1042_s18  ;;  %s1046_s18 = smov (!%p287_p0), [#allocation3]  }
  0x31   : > { %s332_s19 = scalar_select %p331_p1, %s1028_s25, 1 }
  0x32   : > { %s334_s20 = scalar_select %p333_p2, %s1024_s24, 3 }
  0x33   : > { %s759_s30 = sshll.u32 %s332_s19, 3  ;;  %s770_s19 = sshll.u32 %s1028_s25, 3 }
  0x34   : > { %s758_s29 = sshll.u32 %s334_s20, 1  ;;  %s641_s20 = sadd.s32 %s1024_s24, %s770_s19 }
  0x35   : > { %s337_s9 = sadd.s32 %s759_s30, %s758_s29  ;;  %s330_s29 = scalar_lea.vmem [#allocation3], %s1173_s15 }
  0x36   : > { %s760_s13 = sshll.u32 %s337_s9, 3  ;;  %s644_s30 = sshll.u32 %s330_s29, 4  ;;  %s1234_s30 = int_to_ptr.vmem [resolvable:$true] %s644_s30 }
  0x37   : > { %s339_s0 = scalar_lea.vmem %s1298_s1, %s760_s13  ;;  %s771_s9 = sshll.u32 %s641_s20, 7 }
  0x38   : > { %v342_v6 = vld [vmem:[%s339_s0] sm:$0xff]  ;;  %v343_v7 = vld [vmem:[%s339_s0 + $0x8] sm:$0xff]  ;;  %s1044_s0 = smov 124   ;;  %s1240_s15 = scalar_lea.hbm %s1303_s6, %s771_s9 }
  0x39   : > { %s1310_s13 = sand.u32 1, %s1016_s22   ;;  %s946_s17 = scalar_lea.vmem %s1234_s30, 256 }
  0x3a   : > { %s1245_s14 = scalar_lea.sflag [#allocation4], %s1310_s13  ;;  %p947_p3 = scmp.ne.s32.totalorder %s1234_s30, %s946_s17 }
  0x3c   : > { %p948_p4 = pnand %p947_p3, %p1145_p8 }
  0x3e   : > { %p949_p5 = pneg %p948_p4 }
  0xa1   : > { %v909_v5 = vpop.permute.xlu0 %908 }
  0xa2   : > { %v911_v8 = vunpack.i.h.bf16 %v909_v5  ;;  %v910_v9 = vunpack.i.l.bf16 %v909_v5 }
  0xa4   : > { %v354_v10 = vsel %vm352_vm0, %v343_v7, %v911_v8  ;;  %v356_v11 = vsel %vm352_vm0, %v911_v8, %v343_v7  ;;  %v353_v12 = vsel %vm352_vm0, %v342_v6, %v910_v9  ;;  %v355_v13 = vsel %vm352_vm0, %v910_v9, %v342_v6 }
  0xa5   : > { %v917_v14 = vpack.i.bf16 %v356_v11, %v354_v10  ;;  %v912_v15 = vpack.i.bf16 %v355_v13, %v353_v12  ;;  %v813_v16 = vpack.c.bf16 %v354_v10, %v353_v12  ;;  %v530_v10 = vld [vmem:[%s1301_s4 + $0x8] sm:$0xff] }
  0xa7   : > { %918 = vrot.lane.b32.xlu1 %v917_v14, %s1043_s10  ;;  %913 = vrot.lane.b32.xlu0 %v912_v15, %s1043_s10  ;;  %s950_s10 = sshll.u32 %s1046_s18, 4  ;;  %s951_s10 = int_to_ptr.vmem [resolvable:$false] %s950_s10 }
  0xa8   : > { %814 = vmatprep.subr.bf16.mxu0 %v813_v16  ;;  %p953_p6 = scmp.lt.s32.totalorder %s1234_s30, %s951_s10 }
  0xa9   : > { %816 = vmatpush3.bf16.msra.mxu0 %v813_v16 }
  0xab   : > { %923 = vrot.lane.b32.xlu1 %v912_v15, %s1044_s0  ;;  %928 = vrot.lane.b32.xlu0 %v917_v14, %s1044_s0  ;;  %s952_s0 = scalar_lea.vmem %s951_s10, 512 }
  0xac   : > { %p954_p7 = scmp.lt.s32.totalorder %s952_s0, %s946_s17 }
  0xae   : > { %p955_p10 = por %p954_p7, %p953_p6 }
  0xaf   : > { %407 = vperm.xlu1 %932, %v393_v19   ;;  %412 = vperm.xlu0 %933, %v394_v20  }
  0xb0   : > { %p956_p11 = pnand %p955_p10, %p949_p5 }
  0xb3   : > { %397 = vperm.xlu1 %932, %v391_v21   ;;  %535 = vperm.xlu0 %933, %v531_v22  }
  0xb7   : > { %402 = vperm.xlu1 %932, %v392_v23  }
  0xbb   : > { %540 = vperm.xlu1 %932, %v532_v24  }
 0x119   : > { %v919_v25 = vpop.permute.xlu1 %918  ;;  %v914_v26 = vpop.permute.xlu0 %913 }
 0x11a   : > { %v921_v27 = vunpack.i.h.bf16 %v919_v25  ;;  %v920_v28 = vunpack.i.l.bf16 %v919_v25  ;;  %v916_v29 = vunpack.i.h.bf16 %v914_v26  ;;  %v915_v30 = vunpack.i.l.bf16 %v914_v26 }
 0x11c   : > { %v370_v31 = vsel %vm369_vm2, %v915_v30, %v916_v29  ;;  %v371_v32 = vsel %vm369_vm2, %v920_v28, %v921_v27 }
 0x11d   : > { %v924_v33 = vpop.permute.xlu1 %923  ;;  %v929_v34 = vpop.permute.xlu0 %928  ;;  %v817_v35 = vpack.c.bf16 %v371_v32, %v370_v31 }
 0x11e   : > { %v926_v36 = vunpack.i.h.bf16 %v924_v33  ;;  %v925_v37 = vunpack.i.l.bf16 %v924_v33  ;;  %v931_v38 = vunpack.i.h.bf16 %v929_v34  ;;  %v930_v39 = vunpack.i.l.bf16 %v929_v34 }
 0x11f   : > { %818 = vmatprep.subr.bf16.mxu0 %v817_v35 }
 0x120   : > { %820 = vmatpush3.bf16.msra.mxu0 %v817_v35  ;;  %v383_v40 = vsel %vm382_vm3, %v925_v37, %v926_v36  ;;  %v384_v41 = vsel %vm382_vm3, %v930_v39, %v931_v38 }
 0x121   : > { %v821_v42 = vpack.c.bf16 %v384_v41, %v383_v40 }
 0x123   : > { %822 = vmatprep.subr.bf16.mxu0 %v821_v42 }
 0x124   : > { %824 = vmatpush3.bf16.msra.mxu0 %v821_v42 }
 0x127   : > { %801 = vmatmul.mubr.msk.f32.vlgmr.msra.gmra.mrb[0].mxu0 %vm415_vm1, %v388_v43 }
 0x128   : > { %803 = vmatprep.mubr.msk.f32.mxu0 %vm415_vm1, %v389_v44 }
 0x12b   : > { %804 = vmatmul.mubr.msk.f32.gmra.mrb[2].mxu0 %vm415_vm1, %v390_v45 }
 0x12e   : > { %v408_v48 = vpop.permute.xlu1 %407  ;;  %v413_v50 = vpop.permute.xlu0 %412 }
 0x132   : > { %v398_v55 = vpop.permute.xlu1 %397  ;;  %v536_v13 = vpop.permute.xlu0 %535 }
 0x136   : > { %v403_v58 = vpop.permute.xlu1 %402 }
 0x13a   : > { %v541_v11 = vpop.permute.xlu1 %540 }
 0x1fa   : > { %v802_v47 = vpop.f32.mrb[0].mxu0 }
 0x1fb   : > { %v494_v49 = vpop.f32.mrb[1].mxu0  ;;  %v500_v59 = vadd.f32 %v802_v47, %v403_v58 }
 0x1fc   : > { %v495_v60 = vadd.f32 %v494_v49, %v398_v55 }
 0x1fe   : > { %v805_v51 = vpop.f32.mrb[2].mxu0 }
 0x1ff   : > { %v510_v52 = vadd.f32 %v805_v51, %v413_v50  ;;  %v504_v53 = vpop.f32.mrb[3].mxu0 }
 0x200   : > { %v505_v54 = vadd.f32 %v504_v53, %v408_v48 }
 0x201   : > { %v766_v56 = vmul.f32 -1.442695, %v510_v52 }
 0x202   : > { %v765_v57 = vmul.f32 -1.442695, %v505_v54 }
 0x203   : > { %934 = vpow2.f32 %v766_v56 }
 0x204   : > { %936 = vpow2.f32 %v765_v57 }
 0x205   : > { %938 = vtanh.f32 %v500_v59 }
 0x206   : > { %940 = vtanh.f32 %v495_v60 }
 0x20d   : > { %v935_v61 = vpop.eup %934 }
 0x20e   : > { %v937_v62 = vpop.eup %936  ;;  %v522_v63 = vadd.f32 1.0, %v935_v61 }
 0x20f   : > { %v521_v0 = vadd.f32 1.0, %v937_v62  ;;  %v939_v1 = vpop.eup %938 }
 0x210   : > { %942 = vrcp.f32 %v522_v63  ;;  %v941_v4 = vpop.eup %940 }
 0x211   : > { %944 = vrcp.f32 %v521_v0 }
 0x21a   : > { %v943_v5 = vpop.eup %942 }
 0x21b   : > { %v945_v6 = vpop.eup %944  ;;  %v528_v7 = vmul.f32 %v943_v5, %v939_v1 }
 0x21c   : > { %v527_v8 = vmul.f32 %v945_v6, %v941_v4 }
 0x21e   : > { %v825_v9 = vpack.c.bf16 %v528_v7, %v527_v8 }
 0x220   : > { %826 = vmatprep.subr.bf16.mxu1 %v825_v9 }
 0x221   : > { %828 = vmatpush3.bf16.msra.mxu1 %v825_v9 }
 0x224   : > { %811 = vmatmul.mubr.msk.f32.vlgmr.msra.gmra.mrb[0].mxu1 %vm543_vm4, %v530_v10 }
 0x2f7   : > { %v812_v12 = vpop.f32.mrb[0].mxu1 }
 0x2f8   : > { %v622_v14 = vadd.f32 %v812_v12, %v541_v11  ;;  %v616_v15 = vpop.f32.mrb[1].mxu1 }
 0x2f9   : > { %v617_v16 = vadd.f32 %v616_v15, %v536_v13 }
 0x2fa   : > { %v626_v17 = vadd.f32 %v622_v14, %v1178_v3 }
 0x2fb   : > { %v625_v18 = vadd.f32 %v617_v16, %v1176_v2 }
 0x2fc   : > { %628 = vst [vmem:[%s330_s29 + $0x8] sm:$0xff] %v626_v17 }
 0x2fd   : > { %627 = vst [vmem:[%s330_s29] sm:$0xff] %v625_v18 }
 0x2fe   : > { %959 = shalt.err (!%p956_p11)
}
 0x2ff   : > { %s960_s19 = scalar_lea.hbm %s1240_s15, 256  ;;  %s964_s9 = scalar_lea.hbm %s1303_s6, 2048 }
 0x300   : > { %p961_p12 = scmp.ne.s32.totalorder %s1240_s15, %s960_s19  ;;  %p965_p1 = scmp.lt.u32.totalorder %s1240_s15, %s1303_s6 }
 0x301   : > { %p966_p2 = scmp.lt.u32.totalorder %s964_s9, %s960_s19  ;;  %p968_p4 = scmp.lt.u32.totalorder %s960_s19, %s1240_s15 }
 0x302   : > { %p962_p13 = pnand %p961_p12, %p1145_p8 }
 0x303   : > { %p967_p3 = por %p966_p2, %p965_p1 }
 0x304   : > { %p963_p0 = pneg %p962_p13 }
 0x305   : > { %p969_p5 = por %p968_p4, %p967_p3 }
 0x307   : > { %p970_p6 = pnand %p969_p5, %p963_p0 }
 0x309   : > { %973 = shalt.err (!%p970_p6)
}
 0x30a   : > { %s1047_s13 = smov 128   ;;  %s1048_s17 = smov 512  }
 0x30b   : > { %s1049_s18 = smov 8  }
 0x30c   : > { %829 = dma.vmem_to_hbm [thread:$0]  (%p1145_p8), %s1234_s30, 256, %s1240_s15, %s1245_s14, %s1047_s13, %s1048_s17, %s1049_s18  }
 0x30d PF: > { %p835_p7 = scmp.ge.s32.totalorder %s1040_s28, 2  ;;  %s659_s10 = sand.u32 1, %s1012_s21  }
 0x30e   : > { %s660_s0 = scalar_lea.sflag [#allocation4], %s659_s10 }
 0x30f   : > { %p832_p10 = pnand %p835_p7, %p1149_p9 }
 0x311   : > { %1007 = dma.done.wait (!%p832_p10), %s660_s0, 256  }
 0x312   : > { %1009 = vsyncadd (!%p832_p10), %s660_s0, 4294967040  ;;  %s19_s28 = sadd.s32 1, %s1040_s28   ;;  %s1311_s21 = smov %s1016_s22 }
 0x313   : > { %p16_p11 = scmp.ge.s32.totalorder %s19_s28, 10   ;;  %s1312_s22 = smov %s1020_s23 }
 0x314   : > { %s1313_s23 = smov %s1157_s16  ;;  %s1314_s24 = smov %s1032_s26 }
 0x315   : > { %s1315_s25 = smov %s1036_s27  ;;  %s1316_s26 = smov %s1319_s7 }
 0x316   : > { %s1317_s27 = smov %s1323_s8  ;;  %18 = sbr.rel (!%p16_p11) target bundleno = 7 (0x7), region = 125 }
 0x31d   :  { %665 = vsyncpa [#allocation4], 1 }
 0x31e   :  { %667 = vsyncpa [#allocation4 + $0x1], 1 }

</bundles_post_ra>
